<compile_context>
chip_gen: v7x
topology: tpu7x:2x2x1
jax: 0.10.0
libtpu: 0.0.40
codegen_flags: <defaults>
</compile_context>

<pallas_src>
import functools

import jax
import jax.numpy as jnp
from jax.experimental import pallas as pl
from jax.experimental.pallas import tpu as pltpu

K_IN = 784
N1 = 128
N2 = 64
N_OUT = 10
N_OUT_PAD = 128   # lane-dense output; sliced back to 10 in the wrapper
DEFAULT_TB = 512  # batch-tile cap: amortizes ~0.35us/grid-step overhead, ~85% HBM roofline
MIN_TB = 16       # bf16 output packs 16 sublanes/vreg; f32 x only needs 8


def mlp_kernel(x_ref, w1_ref, b1_ref, w2_ref, b2_ref, w3_ref, b3_ref, o_ref):
    # fc1 + ReLU: cast f32 activations to bf16 in-kernel, f32 accumulation on MXU.
    x = x_ref[...].astype(jnp.bfloat16)
    h1 = jnp.dot(x, w1_ref[...], preferred_element_type=jnp.float32)
    h1 = jnp.maximum(h1 + b1_ref[...], 0.0)
    # fc2 + ReLU
    h2 = jnp.dot(h1.astype(jnp.bfloat16), w2_ref[...],
                 preferred_element_type=jnp.float32)
    h2 = jnp.maximum(h2 + b2_ref[...], 0.0)
    # fc3 (no activation); store bf16 (accumulation was f32).
    out = jnp.dot(h2.astype(jnp.bfloat16), w3_ref[...],
                  preferred_element_type=jnp.float32)
    o_ref[...] = (out + b3_ref[...]).astype(o_ref.dtype)


def _round_up(x, m):
    return (x + m - 1) // m * m


def _cdiv(a, b):
    return (a + b - 1) // b


def _choose_batch_tile(batch, max_tb):
    """Large tiles, minimal zero-row padding, and >=2 tiles when possible (v7x megacore)."""
    n_tiles = max(_cdiv(batch, max_tb), 2 if batch >= 2 * MIN_TB else 1)
    return _round_up(_cdiv(batch, n_tiles), MIN_TB)


def prepare_params(w1, b1, w2, b2, w3, b3):
    """One-time weight prep (bf16 casts + lane padding of the last layer).

    Call once and cache/reuse the result; do NOT re-run per forward pass.
    Weights are [in, out]; biases are [1, out].
    """
    w1b = w1.astype(jnp.bfloat16)                                   # (784, 128)
    w2b = w2.astype(jnp.bfloat16)                                   # (128, 64)
    w3p = jnp.zeros((N2, N_OUT_PAD), jnp.bfloat16).at[:, :N_OUT].set(
        w3.astype(jnp.bfloat16))                                    # (64, 128)
    b1f = b1.astype(jnp.float32).reshape(1, N1)
    b2f = b2.astype(jnp.float32).reshape(1, N2)
    b3p = jnp.zeros((1, N_OUT_PAD), jnp.float32).at[:, :N_OUT].set(
        b3.astype(jnp.float32).reshape(1, N_OUT))
    return w1b, b1f, w2b, b2f, w3p, b3p


@functools.partial(jax.jit, static_argnames=("block_b",))
def simple_mlp_prepared(x, params, *, block_b=DEFAULT_TB):
    """x: [B, 784] float32. params: output of prepare_params()."""
    w1b, b1f, w2b, b2f, w3p, b3p = params
    B, K = x.shape
    assert K == K_IN, (B, K)

    tb = _choose_batch_tile(B, block_b)
    b_pad = _round_up(B, tb)
    # Only pad the batch dim, and only when B is not already a tile multiple.
    xk = x if b_pad == B else jnp.pad(x, ((0, b_pad - B), (0, 0)))

    # Weights/biases: full-array blocks with constant index maps -> fetched once,
    # VMEM-resident across all batch tiles.
    const2d = lambda arr: pl.BlockSpec(arr.shape, lambda i: (0, 0))

    out = pl.pallas_call(
        mlp_kernel,
        out_shape=jax.ShapeDtypeStruct((b_pad, N_OUT_PAD), jnp.bfloat16),
        grid=(b_pad // tb,),
        in_specs=[
            # x stream: f32, tiled over batch; 784 == full last dim so no lane padding
            # is required.  Default 2-deep pipeline (DMA-throughput bound).
            pl.BlockSpec((tb, K_IN), lambda i: (i, 0), pipeline_mode=pl.Buffered(2)),
            const2d(w1b), const2d(b1f),
            const2d(w2b), const2d(b2f),
            const2d(w3p), const2d(b3p),
        ],
        out_specs=pl.BlockSpec((tb, N_OUT_PAD), lambda i: (i, 0)),
        compiler_params=pltpu.CompilerParams(
            dimension_semantics=("parallel",),   # shard batch tiles across TCs on v7x
            vmem_limit_bytes=32 << 20,
        ),
    )(xk, w1b, b1f, w2b, b2f, w3p, b3p)

    return out[:B, :N_OUT].astype(jnp.float32)


def simple_mlp(x, w1, b1, w2, b2, w3, b3, *, block_b=DEFAULT_TB):
    """Convenience one-shot wrapper. For repeated calls, prepare_params() once and
    call simple_mlp_prepared() directly."""
    params = prepare_params(w1, b1, w2, b2, w3, b3)
    return simple_mlp_prepared(x, params, block_b=block_b)


def init_linear_params(key, in_features, out_features):
    """Deterministic init mimicking nn.Linear's U(-1/sqrt(in), 1/sqrt(in))."""
    kw, kb = jax.random.split(key)
    bound = 1.0 / jnp.sqrt(jnp.float32(in_features))
    # stored as [in, out] (already transposed relative to PyTorch's [out, in])
    w = jax.random.uniform(kw, (in_features, out_features), jnp.float32, -bound, bound)
    b = jax.random.uniform(kb, (1, out_features), jnp.float32, -bound, bound)
    return w, b


def reference_mlp(x, w1, b1, w2, b2, w3, b3):
    h1 = jnp.maximum(x @ w1 + b1, 0.0)
    h2 = jnp.maximum(h1 @ w2 + b2, 0.0)
    return h2 @ w3 + b3


if __name__ == "__main__":
    key = jax.random.PRNGKey(0)
    kx, k1, k2, k3 = jax.random.split(key, 4)

    B = 8  # small batch for the smoke test
    x = jax.random.normal(kx, (B, K_IN), jnp.float32)

    w1, b1 = init_linear_params(k1, K_IN, N1)
    w2, b2 = init_linear_params(k2, N1, N2)
    w3, b3 = init_linear_params(k3, N2, N_OUT)

    # Weight prep is done ONCE (hoisted out of the per-call path).
    params = prepare_params(w1, b1, w2, b2, w3, b3)
    params = jax.block_until_ready(params)

    out = simple_mlp_prepared(x, params)
    out = jax.block_until_ready(out)

    ref = reference_mlp(x, w1, b1, w2, b2, w3, b3)  # f32 reference
    assert out.shape == (B, N_OUT), out.shape
    # bf16 operands + bf16 output store (f32 accumulation) -> loosened tolerance.
    assert jnp.allclose(out, ref, atol=5e-2, rtol=5e-2), (
        float(jnp.max(jnp.abs(out - ref))))

    print("KERNEL_OK")
</pallas_src>

<mosaic_0001>
module attributes {stable_mosaic.version = 11 : i64} {
  func.func @mlp_kernel(%arg0: i32, %arg1: memref<16x784xf32, #tpu.memory_space<vmem>>, %arg2: memref<784x128xbf16, #tpu.memory_space<vmem>>, %arg3: memref<1x128xf32, #tpu.memory_space<vmem>>, %arg4: memref<128x64xbf16, #tpu.memory_space<vmem>>, %arg5: memref<1x64xf32, #tpu.memory_space<vmem>>, %arg6: memref<64x128xbf16, #tpu.memory_space<vmem>>, %arg7: memref<1x128xf32, #tpu.memory_space<vmem>>, %arg8: memref<16x128xbf16, #tpu.memory_space<vmem>>) attributes {dimension_semantics = [#tpu.dimension_semantics<parallel>], iteration_bounds = array<i64: 1>, scalar_prefetch = 0 : i64, scratch_operands = 0 : i64, tpu.core_type = #tpu.core_type<tc>, window_params = [{pipeline_mode = #tpu.pipeline_mode<double_buffered>, transform_indices = @transform_0, window_bounds = array<i64: 16, 784>}, {pipeline_mode = #tpu.pipeline_mode<synchronous>, transform_indices = @transform_1, window_bounds = array<i64: 784, 128>}, {pipeline_mode = #tpu.pipeline_mode<synchronous>, transform_indices = @transform_2, window_bounds = array<i64: 1, 128>}, {pipeline_mode = #tpu.pipeline_mode<synchronous>, transform_indices = @transform_3, window_bounds = array<i64: 128, 64>}, {pipeline_mode = #tpu.pipeline_mode<synchronous>, transform_indices = @transform_4, window_bounds = array<i64: 1, 64>}, {pipeline_mode = #tpu.pipeline_mode<synchronous>, transform_indices = @transform_5, window_bounds = array<i64: 64, 128>}, {pipeline_mode = #tpu.pipeline_mode<synchronous>, transform_indices = @transform_6, window_bounds = array<i64: 1, 128>}, {transform_indices = @transform_7, window_bounds = array<i64: 16, 128>}]} {
    %c0 = arith.constant 0 : index
    %c0_0 = arith.constant 0 : index
    %0 = vector.load %arg1[%c0, %c0_0] : memref<16x784xf32, #tpu.memory_space<vmem>>, vector<16x784xf32>
    %1 = arith.truncf %0 : vector<16x784xf32> to vector<16x784xbf16>
    %c0_1 = arith.constant 0 : index
    %c0_2 = arith.constant 0 : index
    %2 = vector.load %arg2[%c0_1, %c0_2] : memref<784x128xbf16, #tpu.memory_space<vmem>>, vector<784x128xbf16>
    %cst = arith.constant dense<0.000000e+00> : vector<16x128xf32>
    %3 = tpu.matmul %1, %2, %cst {dimension_numbers = #tpu.dot_dimension_numbers<[1], [0], [0], [1], [0, 0, 1, 1], [], []>} : vector<16x784xbf16>, vector<784x128xbf16>, vector<16x128xf32> -> vector<16x128xf32>
    %c0_3 = arith.constant 0 : index
    %c0_4 = arith.constant 0 : index
    %4 = vector.load %arg3[%c0_3, %c0_4] : memref<1x128xf32, #tpu.memory_space<vmem>>, vector<1x128xf32>
    %5 = vector.broadcast %4 : vector<1x128xf32> to vector<16x128xf32>
    %6 = arith.addf %3, %5 : vector<16x128xf32>
    %cst_5 = arith.constant 0.000000e+00 : f32
    %7 = vector.broadcast %cst_5 : f32 to vector<16x128xf32>
    %8 = arith.maximumf %6, %7 : vector<16x128xf32>
    %9 = arith.truncf %8 : vector<16x128xf32> to vector<16x128xbf16>
    %c0_6 = arith.constant 0 : index
    %c0_7 = arith.constant 0 : index
    %10 = vector.load %arg4[%c0_6, %c0_7] : memref<128x64xbf16, #tpu.memory_space<vmem>>, vector<128x64xbf16>
    %cst_8 = arith.constant dense<0.000000e+00> : vector<16x64xf32>
    %11 = tpu.matmul %9, %10, %cst_8 {dimension_numbers = #tpu.dot_dimension_numbers<[1], [0], [0], [1], [0, 0, 1, 1], [], []>} : vector<16x128xbf16>, vector<128x64xbf16>, vector<16x64xf32> -> vector<16x64xf32>
    %c0_9 = arith.constant 0 : index
    %c0_10 = arith.constant 0 : index
    %12 = vector.load %arg5[%c0_9, %c0_10] : memref<1x64xf32, #tpu.memory_space<vmem>>, vector<1x64xf32>
    %13 = vector.broadcast %12 : vector<1x64xf32> to vector<16x64xf32>
    %14 = arith.addf %11, %13 : vector<16x64xf32>
    %cst_11 = arith.constant 0.000000e+00 : f32
    %15 = vector.broadcast %cst_11 : f32 to vector<16x64xf32>
    %16 = arith.maximumf %14, %15 : vector<16x64xf32>
    %17 = arith.truncf %16 : vector<16x64xf32> to vector<16x64xbf16>
    %c0_12 = arith.constant 0 : index
    %c0_13 = arith.constant 0 : index
    %18 = vector.load %arg6[%c0_12, %c0_13] : memref<64x128xbf16, #tpu.memory_space<vmem>>, vector<64x128xbf16>
    %cst_14 = arith.constant dense<0.000000e+00> : vector<16x128xf32>
    %19 = tpu.matmul %17, %18, %cst_14 {dimension_numbers = #tpu.dot_dimension_numbers<[1], [0], [0], [1], [0, 0, 1, 1], [], []>} : vector<16x64xbf16>, vector<64x128xbf16>, vector<16x128xf32> -> vector<16x128xf32>
    %c0_15 = arith.constant 0 : index
    %c0_16 = arith.constant 0 : index
    %20 = vector.load %arg7[%c0_15, %c0_16] : memref<1x128xf32, #tpu.memory_space<vmem>>, vector<1x128xf32>
    %21 = vector.broadcast %20 : vector<1x128xf32> to vector<16x128xf32>
    %22 = arith.addf %19, %21 : vector<16x128xf32>
    %23 = arith.truncf %22 : vector<16x128xf32> to vector<16x128xbf16>
    %c0_17 = arith.constant 0 : index
    %c0_18 = arith.constant 0 : index
    %24 = vector.load %arg8[%c0_17, %c0_18] : memref<16x128xbf16, #tpu.memory_space<vmem>>, vector<16x128xbf16>
    tpu.vector_store %arg8[%c0_17, %c0_18], %23 {strides = array<i32>} : memref<16x128xbf16, #tpu.memory_space<vmem>>, vector<16x128xbf16>,
    return
  }
  func.func @transform_0(%arg0: i32) -> (i32, i32) {
    %c0_i32 = arith.constant 0 : i32
    %c0_i32_0 = arith.constant 0 : i32
    return %arg0, %c0_i32 : i32, i32
  }
  func.func @transform_1(%arg0: i32) -> (i32, i32) {
    %c0_i32 = arith.constant 0 : i32
    %c0_i32_0 = arith.constant 0 : i32
    %c0_i32_1 = arith.constant 0 : i32
    return %c0_i32, %c0_i32_0 : i32, i32
  }
  func.func @transform_2(%arg0: i32) -> (i32, i32) {
    %c0_i32 = arith.constant 0 : i32
    %c0_i32_0 = arith.constant 0 : i32
    %c0_i32_1 = arith.constant 0 : i32
    return %c0_i32, %c0_i32_0 : i32, i32
  }
  func.func @transform_3(%arg0: i32) -> (i32, i32) {
    %c0_i32 = arith.constant 0 : i32
    %c0_i32_0 = arith.constant 0 : i32
    %c0_i32_1 = arith.constant 0 : i32
    return %c0_i32, %c0_i32_0 : i32, i32
  }
  func.func @transform_4(%arg0: i32) -> (i32, i32) {
    %c0_i32 = arith.constant 0 : i32
    %c0_i32_0 = arith.constant 0 : i32
    %c0_i32_1 = arith.constant 0 : i32
    return %c0_i32, %c0_i32_0 : i32, i32
  }
  func.func @transform_5(%arg0: i32) -> (i32, i32) {
    %c0_i32 = arith.constant 0 : i32
    %c0_i32_0 = arith.constant 0 : i32
    %c0_i32_1 = arith.constant 0 : i32
    return %c0_i32, %c0_i32_0 : i32, i32
  }
  func.func @transform_6(%arg0: i32) -> (i32, i32) {
    %c0_i32 = arith.constant 0 : i32
    %c0_i32_0 = arith.constant 0 : i32
    %c0_i32_1 = arith.constant 0 : i32
    return %c0_i32, %c0_i32_0 : i32, i32
  }
  func.func @transform_7(%arg0: i32) -> (i32, i32) {
    %c0_i32 = arith.constant 0 : i32
    %c0_i32_0 = arith.constant 0 : i32
    return %arg0, %c0_i32 : i32, i32
  }
}

</mosaic_0001>

<bundles_post_ra>
// kernel: simple_mlp_prepared.1
= control target key start
LH: loop header
LB: loop body
LE: loop exit
PB: predicated region body
PF: predicated region fallthrough
CT: control target
= control target key end

     0   :  { %12 = vsyncpa [#allocation3], 0  ;;  %s1131_s24 = smov [#allocation2]   ;;  %s1297_s0 = inlined_call_operand.vmem [shape: f32[16,784], index: 0, kind: input, shape index: {}]   ;;  %s1298_s1 = inlined_call_operand.hbm [shape: bf16[784,128], index: 1, kind: input, shape index: {}]   ;;  %s1299_s2 = inlined_call_operand.vmem [shape: f32[1,128], index: 2, kind: input, shape index: {}]   ;;  %s1300_s3 = inlined_call_operand.vmem [shape: bf16[128,64], index: 3, kind: input, shape index: {}]   ;;  %s1301_s4 = inlined_call_operand.vmem [shape: f32[1,64], index: 4, kind: input, shape index: {}]   ;;  %s1302_s5 = inlined_call_operand.vmem [shape: bf16[64,128], index: 5, kind: input, shape index: {}]   ;;  %s1303_s6 = inlined_call_operand.vmem [shape: f32[1,128], index: 6, kind: input, shape index: {}]   ;;  %s1304_s7 = inlined_call_operand.vmem [shape: bf16[16,128], index: 7, kind: output, shape index: {}]  }
   0x1   :  { %s20_s25 = sshll.u32 %s1131_s24, 4  ;;  %s1107_s28 = scalar_lea.hbm %s1298_s1, 6272  ;;  %s21_s25 = int_to_ptr.vmem [resolvable:$true] %s20_s25 }
   0x2   :  { %p1108_p0 = scmp.ne.s32.totalorder %s1298_s1, %s1107_s28  ;;  %p1111_p1 = scmp.lt.u32.totalorder %s1107_s28, %s1298_s1 }
   0x4   :  { %p1113_p2 = pnand %p1111_p1, %p1108_p0 }
   0x6   :  { %1116 = shalt.err (!%p1113_p2)
}
   0x7   :  { %s1117_s10 = scalar_lea.vmem %s21_s25, 6272  ;;  %p1122_p4 = scmp.lt.s32.totalorder %s21_s25, %s21_s25 }
   0x8   :  { %p1118_p3 = scmp.ne.s32.totalorder %s21_s25, %s1117_s10  ;;  %p1123_p5 = scmp.lt.s32.totalorder %s1117_s10, %s1117_s10 }
   0xa   :  { %p1124_p6 = por %p1123_p5, %p1122_p4 }
   0xc   :  { %p1125_p7 = pnand %p1124_p6, %p1118_p3 }
   0xe   :  { %1128 = shalt.err (!%p1125_p7)
}
   0xf   :  { %s1132_s11 = smov 64   ;;  %s1133_s12 = smov 4  }
  0x10   :  { %26 = dma.hbm_to_vmem [thread:$0]  %s1298_s1, 6272, %s21_s25, [#allocation3], %s1132_s11, %s1132_s11, %s1133_s12  }
  0x11   :  { %1129 = dma.done.wait [#allocation3], 6272  }
  0x12   :  { %1130 = vsyncadd [#allocation3], 4294961024  ;;  %v1046_v0 = vld [vmem:[#allocation2 + $0x40] sm:$0xff]   ;;  %v1050_v4 = vld [vmem:[#allocation2 + $0x48] sm:$0xff]   ;;  %v1134_v43 = vmov 0.0   ;;  %vm1135_vm0 = vmmov 0  }
  0x13   :  { %v1047_v1 = vld [vmem:[#allocation2] sm:$0xff]   ;;  %921 = vmatprep.subr.bf16.mxu0 %v1046_v0  ;;  %v1051_v5 = vld [vmem:[#allocation2 + $0x8] sm:$0xff]   ;;  %v1054_v8 = vld [vmem:[#allocation2 + $0x50] sm:$0xff]   ;;  %vm461_vm1 = vcmask 130048   ;;  %vm786_vm2 = vcmask 523264  }
  0x14   :  { %v1048_v2 = vld [vmem:[#allocation2 + $0xc0] sm:$0xff]   ;;  %922 = vmatpush3.bf16.msra.mxu0 %v1047_v1  ;;  %v1052_v6 = vld [vmem:[#allocation2 + $0xc8] sm:$0xff]   ;;  %v1055_v9 = vld [vmem:[#allocation2 + $0x10] sm:$0xff]  }
  0x15   :  { %v1049_v3 = vld [vmem:[#allocation2 + $0x80] sm:$0xff]   ;;  %943 = vmatprep.subr.bf16.mxu1 %v1048_v2  ;;  %923 = vmatprep.subr.bf16.mxu0 %v1050_v4  ;;  %v1053_v7 = vld [vmem:[#allocation2 + $0x88] sm:$0xff]   ;;  %v1056_v10 = vld [vmem:[#allocation2 + $0xd0] sm:$0xff]  }
  0x16   :  { %944 = vmatpush3.bf16.msra.mxu1 %v1049_v3  ;;  %v1057_v11 = vld [vmem:[#allocation2 + $0x90] sm:$0xff]   ;;  %v1058_v12 = vld [vmem:[#allocation2 + $0x58] sm:$0xff]   ;;  %v1062_v16 = vld [vmem:[#allocation2 + $0x60] sm:$0xff]  }
  0x17   :  { %945 = vmatprep.subr.bf16.mxu1 %v1052_v6  ;;  %v1059_v13 = vld [vmem:[#allocation2 + $0x18] sm:$0xff]   ;;  %v1063_v17 = vld [vmem:[#allocation2 + $0x20] sm:$0xff]   ;;  %v1066_v20 = vld [vmem:[#allocation2 + $0x68] sm:$0xff]  }
  0x18   :  { %924 = vmatpush3.bf16.msra.mxu0 %v1051_v5  ;;  %v1060_v14 = vld [vmem:[#allocation2 + $0xd8] sm:$0xff]   ;;  %v1064_v18 = vld [vmem:[#allocation2 + $0xe0] sm:$0xff]   ;;  %v1067_v21 = vld [vmem:[#allocation2 + $0x28] sm:$0xff]  }
  0x19   :  { %925 = vmatprep.subr.bf16.mxu0 %v1054_v8  ;;  %v1061_v15 = vld [vmem:[#allocation2 + $0x98] sm:$0xff]   ;;  %v1065_v19 = vld [vmem:[#allocation2 + $0xa0] sm:$0xff]   ;;  %v1068_v22 = vld [vmem:[#allocation2 + $0xe8] sm:$0xff]  }
  0x1a   :  { %946 = vmatpush3.bf16.msra.mxu1 %v1053_v7  ;;  %v1069_v23 = vld [vmem:[#allocation2 + $0xa8] sm:$0xff]   ;;  %v1070_v24 = vld [vmem:[#allocation2 + $0x70] sm:$0xff]   ;;  %v1074_v28 = vld [vmem:[#allocation2 + $0x78] sm:$0xff]  }
  0x1b   :  { %947 = vmatprep.subr.bf16.mxu1 %v1056_v10  ;;  %v1071_v25 = vld [vmem:[#allocation2 + $0x30] sm:$0xff]   ;;  %v1075_v29 = vld [vmem:[#allocation2 + $0x38] sm:$0xff]   ;;  %v42_v31 = vld [vmem:[%s1297_s0 + $0x8] sm:$0xff] }
  0x1c   :  { %926 = vmatpush3.bf16.msra.mxu0 %v1055_v9  ;;  %v1072_v26 = vld [vmem:[#allocation2 + $0xf0] sm:$0xff]   ;;  %v1076_v30 = vld [vmem:[#allocation2 + $0xf8] sm:$0xff]   ;;  %v49_v32 = vld [vmem:[%s1297_s0 + $0x40] sm:$0xff] }
  0x1d   :  { %927 = vmatprep.subr.bf16.mxu0 %v1058_v12  ;;  %v1073_v27 = vld [vmem:[#allocation2 + $0xb0] sm:$0xff]   ;;  %v56_v33 = vpack.c.bf16 %v49_v32, %v42_v31  ;;  %v1077_v34 = vld [vmem:[#allocation2 + $0xb8] sm:$0xff]   ;;  %v41_v35 = vld [vmem:[%s1297_s0] sm:$0xff] }
  0x1e   :  { %948 = vmatpush3.bf16.msra.mxu1 %v1057_v11  ;;  %v48_v36 = vld [vmem:[%s1297_s0 + $0x38] sm:$0xff]  ;;  %v1078_v38 = vld [vmem:[#allocation2 + $0x140] sm:$0xff]   ;;  %v51_v40 = vld [vmem:[%s1297_s0 + $0x50] sm:$0xff] }
  0x1f   :  { %949 = vmatprep.subr.bf16.mxu1 %v1060_v14  ;;  %497 = vmatprep.mubr.bf16.mxu0 %v56_v33  ;;  %v55_v37 = vpack.c.bf16 %v48_v36, %v41_v35  ;;  %v44_v39 = vld [vmem:[%s1297_s0 + $0x18] sm:$0xff]  ;;  %v1079_v42 = vld [vmem:[#allocation2 + $0x100] sm:$0xff]   ;;  %v43_v44 = vld [vmem:[%s1297_s0 + $0x10] sm:$0xff] }
  0x20   :  { %928 = vmatpush3.bf16.msra.mxu0 %v1059_v13  ;;  %v58_v41 = vpack.c.bf16 %v51_v40, %v44_v39  ;;  %v50_v45 = vld [vmem:[%s1297_s0 + $0x48] sm:$0xff]  ;;  %v1082_v49 = vld [vmem:[#allocation2 + $0x150] sm:$0xff]   ;;  %v1084_v51 = vld [vmem:[#allocation2 + $0x158] sm:$0xff]  }
  0x21   :  { %929 = vmatprep.subr.bf16.mxu0 %v1062_v16  ;;  %v57_v46 = vpack.c.bf16 %v50_v45, %v43_v44  ;;  %v1080_v47 = vld [vmem:[#allocation2 + $0x148] sm:$0xff]   ;;  %v1083_v50 = vld [vmem:[#allocation2 + $0x110] sm:$0xff]   ;;  %v1085_v52 = vld [vmem:[#allocation2 + $0x118] sm:$0xff]  }
  0x22   :  { %950 = vmatpush3.bf16.msra.mxu1 %v1061_v15  ;;  %538 = vmatprep.mubr.bf16.mxu1 %v58_v41  ;;  %v1081_v48 = vld [vmem:[#allocation2 + $0x108] sm:$0xff]   ;;  %v1086_v53 = vld [vmem:[#allocation2 + $0x160] sm:$0xff]   ;;  %v1090_v59 = vld [vmem:[#allocation2 + $0x170] sm:$0xff]  }
  0x23   :  { %951 = vmatprep.subr.bf16.mxu1 %v1064_v18  ;;  %v1087_v54 = vld [vmem:[#allocation2 + $0x120] sm:$0xff]   ;;  %v1088_v55 = vld [vmem:[#allocation2 + $0x168] sm:$0xff]   ;;  %v47_v62 = vld [vmem:[%s1297_s0 + $0x30] sm:$0xff] }
  0x24   :  { %930 = vmatpush3.bf16.msra.mxu0 %v1063_v17  ;;  %v1094_v56 = vld [vmem:[#allocation2 + $0x180] sm:$0xff]   ;;  %v46_v57 = vld [vmem:[%s1297_s0 + $0x28] sm:$0xff]  ;;  %v1091_v1 = vld [vmem:[#allocation2 + $0x130] sm:$0xff]  }
  0x25   :  { %931 = vmatprep.subr.bf16.mxu0 %v1066_v20  ;;  %v1089_v58 = vld [vmem:[#allocation2 + $0x128] sm:$0xff]   ;;  %v53_v60 = vld [vmem:[%s1297_s0 + $0x60] sm:$0xff]  ;;  %v1092_v2 = vld [vmem:[#allocation2 + $0x178] sm:$0xff]  }
  0x26   :  { %952 = vmatpush3.bf16.msra.mxu1 %v1065_v19  ;;  %v60_v61 = vpack.c.bf16 %v53_v60, %v46_v57  ;;  %v54_v63 = vld [vmem:[%s1297_s0 + $0x68] sm:$0xff]  ;;  %v1093_v3 = vld [vmem:[#allocation2 + $0x138] sm:$0xff]   ;;  %v45_v4 = vld [vmem:[%s1297_s0 + $0x20] sm:$0xff] }
  0x27   :  { %953 = vmatprep.subr.bf16.mxu1 %v1068_v22  ;;  %v61_v0 = vpack.c.bf16 %v54_v63, %v47_v62  ;;  %v52_v5 = vld [vmem:[%s1297_s0 + $0x58] sm:$0xff]  ;;  %v1095_v7 = vld [vmem:[%s1300_s3] sm:$0xff]   ;;  %v1096_v8 = vld [vmem:[%s1300_s3 + $0x8] sm:$0xff]  }
  0x28   :  { %932 = vmatpush3.bf16.msra.mxu0 %v1067_v21  ;;  %v59_v6 = vpack.c.bf16 %v52_v5, %v45_v4  ;;  %v1097_v9 = vld [vmem:[%s1300_s3 + $0x10] sm:$0xff]   ;;  %v1098_v10 = vld [vmem:[%s1300_s3 + $0x18] sm:$0xff]   ;;  %v1099_v11 = vld [vmem:[%s1300_s3 + $0x20] sm:$0xff]  }
  0x29   :  { %933 = vmatprep.subr.bf16.mxu0 %v1070_v24  ;;  %v1100_v12 = vld [vmem:[%s1300_s3 + $0x28] sm:$0xff]   ;;  %v1101_v13 = vld [vmem:[%s1300_s3 + $0x30] sm:$0xff]   ;;  %v1102_v14 = vld [vmem:[%s1300_s3 + $0x38] sm:$0xff]  }
  0x2a   :  { %954 = vmatpush3.bf16.msra.mxu1 %v1069_v23  ;;  %v1103_v15 = vld [vmem:[%s1302_s5] sm:$0xff]   ;;  %v1104_v16 = vld [vmem:[%s1302_s5 + $0x8] sm:$0xff]  }
  0x2b   :  { %955 = vmatprep.subr.bf16.mxu1 %v1072_v26  ;;  %v846_v18 = vld [vmem:[%s1299_s2] ss:$0 sm:$0xff] }
  0x2c   :  { %934 = vmatpush3.bf16.msra.mxu0 %v1071_v25 }
  0x2d   :  { %935 = vmatprep.subr.bf16.mxu0 %v1074_v28 }
  0x2e   :  { %956 = vmatpush3.bf16.msra.mxu1 %v1073_v27 }
  0x2f   :  { %957 = vmatprep.subr.bf16.mxu1 %v1076_v30 }
  0x30   :  { %936 = vmatpush3.bf16.msra.mxu0 %v1075_v29 }
  0x31   :  { %965 = vmatprep.subr.bf16.mxu0 %v1078_v38 }
  0x32   :  { %958 = vmatpush3.bf16.msra.mxu1 %v1077_v34 }
  0x33   :  { %1003 = vmatprep.subr.bf16.mxu1 %v1134_v43  ;;  %498 = vmatmul.mubr.bf16.vlgmr.msra.gmra.mrb[0].mxu0 %v55_v37 }
  0x34   :  { %966 = vmatpush3.bf16.msra.mxu0 %v1079_v42  ;;  %579 = vmatprep.mubr.bf16.mxu0 %v60_v61 }
  0x35   :  { %539 = vmatmul.mubr.bf16.vlgmr.msra.gmra.mrb[0].mxu1 %v57_v46  ;;  %967 = vmatprep.subr.bf16.mxu0 %v1080_v47 }
  0x36   :  { %1005 = vmatprep.mubr.msk.bf16.mxu1 %vm1135_vm0, %v1134_v43  ;;  %1004 = vmatpush3.bf16.msra.mxu1 %v1094_v56 }
  0x37   :  { %1009 = vmatprep.subr.bf16.mxu1 %v1134_v43 }
  0x38   :  { %968 = vmatpush3.bf16.msra.mxu0 %v1081_v48 }
  0x39   :  { %969 = vmatprep.subr.bf16.mxu0 %v1082_v49 }
  0x3c   :  { %970 = vmatpush3.bf16.msra.mxu0 %v1083_v50 }
  0x3d   :  { %971 = vmatprep.subr.bf16.mxu0 %v1084_v51  ;;  %1006 = vmatmul.mubr.msk.bf16.vlgmr.msra.gmra.mrb[4].mxu1 %vm461_vm1, %v61_v0 }
  0x3e   :  { %1025 = vmatprep.mubr.msk.bf16.mxu1 %vm1135_vm0, %v1134_v43  ;;  %1010 = vmatpush3.bf16.msra.mxu1 %v1095_v7 }
  0x3f   :  { %1011 = vmatprep.subr.bf16.mxu1 %v1134_v43 }
  0x40   :  { %972 = vmatpush3.bf16.msra.mxu0 %v1085_v52  ;;  %v1105_v52 = vld [vmem:[%s1302_s5 + $0x10] sm:$0xff]  }
  0x41   :  { %973 = vmatprep.subr.bf16.mxu0 %v1086_v53  ;;  %v1106_v53 = vld [vmem:[%s1302_s5 + $0x18] sm:$0xff]  }
  0x42   :  { %1012 = vmatpush3.bf16.msra.mxu1 %v1096_v8 }
  0x43   :  { %1013 = vmatprep.subr.bf16.mxu1 %v1134_v43 }
  0x44   :  { %974 = vmatpush3.bf16.msra.mxu0 %v1087_v54  ;;  %v897_v54 = vld [vmem:[%s1301_s4] ss:$0 sm:$0xff] }
  0x45   :  { %975 = vmatprep.subr.bf16.mxu0 %v1088_v55 }
  0x46   :  { %1014 = vmatpush3.bf16.msra.mxu1 %v1097_v9 }
  0x47   :  { %1015 = vmatprep.subr.bf16.mxu1 %v1134_v43 }
  0x48   :  { %976 = vmatpush3.bf16.msra.mxu0 %v1089_v58 }
  0x49   :  { %977 = vmatprep.subr.bf16.mxu0 %v1090_v59 }
  0x4a   :  { %1016 = vmatpush3.bf16.msra.mxu1 %v1098_v10 }
  0x4b   :  { %1017 = vmatprep.subr.bf16.mxu1 %v1134_v43 }
  0x4c   :  { %978 = vmatpush3.bf16.msra.mxu0 %v1091_v1 }
  0x4d   :  { %979 = vmatprep.subr.bf16.mxu0 %v1092_v2 }
  0x4e   :  { %1018 = vmatpush3.bf16.msra.mxu1 %v1099_v11 }
  0x4f   :  { %1019 = vmatprep.subr.bf16.mxu1 %v1134_v43 }
  0x50   :  { %980 = vmatpush3.bf16.msra.mxu0 %v1093_v3 }
  0x51   :  { %1029 = vmatprep.subr.bf16.mxu0 %v1134_v43 }
  0x52   :  { %1020 = vmatpush3.bf16.msra.mxu1 %v1100_v12 }
  0x53   :  { %580 = vmatmul.mubr.bf16.vlgmr.msra.gmra.mrb[4].mxu0 %v59_v6  ;;  %1021 = vmatprep.subr.bf16.mxu1 %v1134_v43 }
  0x54   :  { %1037 = vmatprep.mubr.msk.bf16.mxu0 %vm1135_vm0, %v1134_v43  ;;  %1030 = vmatpush3.bf16.msra.mxu0 %v1103_v15 }
  0x55   :  { %1031 = vmatprep.subr.bf16.mxu0 %v1134_v43 }
  0x56   :  { %1022 = vmatpush3.bf16.msra.mxu1 %v1101_v13 }
  0x57   :  { %1023 = vmatprep.subr.bf16.mxu1 %v1134_v43 }
  0x58   :  { %1032 = vmatpush3.bf16.msra.mxu0 %v1104_v16 }
  0x59   :  { %1033 = vmatprep.subr.bf16.mxu0 %v1134_v43 }
  0x5a   :  { %1024 = vmatpush3.bf16.msra.mxu1 %v1102_v14 }
  0x5c   :  { %1034 = vmatpush3.bf16.msra.mxu0 %v1105_v52 }
  0x5d   :  { %1035 = vmatprep.subr.bf16.mxu0 %v1134_v43  ;;  %v906_v43 = vld [vmem:[%s1303_s6] ss:$0 sm:$0xff] }
  0x60   :  { %1036 = vmatpush3.bf16.msra.mxu0 %v1106_v53 }
 0x106   :  { %v937_v17 = vpop.f32.mrb[0].mxu0 }
 0x107   :  { %v938_v19 = vpop.f32.mrb[1].mxu0 }
 0x108   :  { %v939_v20 = vadd.f32 %v938_v19, %v937_v17  ;;  %v940_v21 = vpop.f32.mrb[2].mxu0  ;;  %v959_v22 = vpop.f32.mrb[0].mxu1 }
 0x109   :  { %v941_v23 = vpop.f32.mrb[3].mxu0  ;;  %v960_v26 = vpop.f32.mrb[1].mxu1 }
 0x10a   :  { %v500_v24 = vadd.f32 %v939_v20, %v846_v18  ;;  %v942_v25 = vadd.f32 %v941_v23, %v940_v21  ;;  %v961_v27 = vadd.f32 %v960_v26, %v959_v22  ;;  %v962_v28 = vpop.f32.mrb[2].mxu1 }
 0x10b   :  { %v963_v30 = vpop.f32.mrb[3].mxu1 }
 0x10c   :  { %v503_v29 = vadd.f32 %v942_v25, %v846_v18  ;;  %v541_v31 = vadd.f32 %v961_v27, %v500_v24  ;;  %v964_v32 = vadd.f32 %v963_v30, %v962_v28 }
 0x10e   :  { %v544_v33 = vadd.f32 %v964_v32, %v503_v29 }
 0x110   :  { %v622_v34 = vpop.f32.mrb[4].mxu1 }
 0x111   :  { %v1007_v35 = vpop.f32.mrb[5].mxu1 }
 0x112   :  { %v625_v36 = vpop.f32.mrb[6].mxu1 }
 0x113   :  { %v1008_v37 = vpop.f32.mrb[7].mxu1 }
 0x126   :  { %v981_v38 = vpop.f32.mrb[4].mxu0 }
 0x127   :  { %v982_v39 = vpop.f32.mrb[5].mxu0 }
 0x128   :  { %v983_v40 = vadd.f32 %v982_v39, %v981_v38  ;;  %v984_v41 = vpop.f32.mrb[6].mxu0 }
 0x129   :  { %v985_v42 = vpop.f32.mrb[7].mxu0 }
 0x12a   :  { %v582_v44 = vadd.f32 %v983_v40, %v541_v31  ;;  %v986_v45 = vadd.f32 %v985_v42, %v984_v41 }
 0x12c   :  { %v623_v46 = vadd.f32 %v622_v34, %v582_v44  ;;  %v585_v47 = vadd.f32 %v986_v45, %v544_v33 }
 0x12e   :  { %v626_v48 = vadd.f32 %v625_v36, %v585_v47  ;;  %v629_v49 = vmax.f32 %v623_v46, 0.0 }
 0x130   :  { %v630_v50 = vmax.f32 %v626_v48, 0.0 }
 0x132   :  { %v631_v51 = vpack.c.bf16 %v630_v50, %v629_v49 }
 0x134   :  { %1026 = vmatmul.mubr.bf16.vlgmr.msra.gmra.mrb[8].mxu1 %v631_v51 }
 0x207   :  { %v737_v55 = vpop.f32.mrb[8].mxu1 }
 0x208   :  { %v738_v56 = vadd.f32 %v897_v54, %v737_v55  ;;  %v1027_v57 = vpop.f32.mrb[9].mxu1 }
 0x209   :  { %v740_v58 = vpop.f32.mrb[10].mxu1 }
 0x20a   :  { %v741_v59 = vadd.f32 %v897_v54, %v740_v58  ;;  %v1028_v60 = vpop.f32.mrb[11].mxu1  ;;  %v744_v61 = vmax.f32 %v738_v56, 0.0 }
 0x20c   :  { %v745_v62 = vmax.f32 %v741_v59, 0.0 }
 0x20e   :  { %v746_v63 = vpack.c.bf16 %v745_v62, %v744_v61 }
 0x210   :  { %1038 = vmatmul.mubr.msk.bf16.vlgmr.msra.gmra.mrb[8].mxu0 %vm786_vm2, %v746_v63 }
 0x2e3   :  { %v824_v0 = vpop.f32.mrb[8].mxu0 }
 0x2e4   :  { %v1039_v1 = vpop.f32.mrb[9].mxu0  ;;  %v825_v3 = vadd.f32 %v906_v43, %v824_v0 }
 0x2e5   :  { %v827_v2 = vpop.f32.mrb[10].mxu0 }
 0x2e6   :  { %v828_v4 = vadd.f32 %v906_v43, %v827_v2  ;;  %v1040_v5 = vpop.f32.mrb[11].mxu0 }
 0x2e8   :  { %v919_v6 = vpack.c.bf16 %v828_v4, %v825_v3 }
 0x2ea   :  { %920 = vst [vmem:[%s1304_s7] sm:$0xff] %v919_v6  }
 0x2eb   :  { %845 = vsyncpa [#allocation3], 1 }

</bundles_post_ra>
